<compile_context>
chip_gen: v5e
topology: v5e:2x2
jax: 0.10.0
libtpu: 0.0.40
codegen_flags: <defaults>
</compile_context>

<pallas_src>
import jax
import jax.numpy as jnp
from jax.experimental import pallas as pl
from jax.experimental.pallas import tpu as pltpu


def _round_up(n: int, m: int) -> int:
    return ((n + m - 1) // m) * m


def qm_mlp_kernel(x_ref, w1_ref, b1_ref, w2_ref, b2_ref, w3_ref, b3_ref, o_ref):
    """One batch tile of the fused 3-layer MLP.

    x_ref  : (TB, D)    f32 (or bf16)
    w1_ref : (D, 128)   bf16  (resident)
    b1_ref : (1, 128)   f32   (resident)
    w2_ref : (128, 64)  bf16  (resident)
    b2_ref : (1, 64)    f32   (resident)
    w3_ref : (1, 64)    f32   (fc3 weight as a row, resident)
    b3_ref : (1,)       f32   in SMEM
    o_ref  : (TB, 1)    f32
    """
    # fc1 + ReLU: bf16 MXU operands, f32 accumulation, f32 epilogue.
    h1 = jnp.dot(x_ref[...].astype(jnp.bfloat16), w1_ref[...],
                 preferred_element_type=jnp.float32)
    h1 = jnp.maximum(h1 + b1_ref[...], 0.0)

    # fc2 + ReLU
    h2 = jnp.dot(h1.astype(jnp.bfloat16), w2_ref[...],
                 preferred_element_type=jnp.float32)
    h2 = jnp.maximum(h2 + b2_ref[...], 0.0)

    # fc3 (out_features == 1): VPU multiply + XLU cross-lane reduce.  Keeps the
    # single-output-column contraction off the MXU (which is the binding slot
    # for fc1/fc2) and avoids any h2 transpose / M=1 weight-load traffic.
    out = jnp.sum(h2 * w3_ref[...], axis=-1, keepdims=True) + b3_ref[0]
    o_ref[...] = out.astype(o_ref.dtype)


def _choose_batch_tile(B: int, D: int):
    """Pick the batch tile TB (multiple of 128) and padded batch size."""
    B_pad_full = _round_up(B, 128)

    # Per-row tile-dependent live VMEM (approx): x tile double-buffered
    # (2 * itemsize * D, f32 worst case -> 8*D) + bf16 x copy (2*D) + f32 h1
    # (512) + bf16 h1 (256) + f32 h2 (256) + fc3 temp (256) + out (~8).
    bytes_per_row = 10 * D + 1300
    tile_vmem_budget = 24 * 1024 * 1024          # leaves headroom inside 48 MiB
    tb_cap = min(8192, tile_vmem_budget // bytes_per_row)
    tb_cap = max(128, (tb_cap // 128) * 128)

    if B_pad_full <= 1024:
        # Batch too small to split usefully; one tile, no extra padding.
        tb = B_pad_full
    else:
        # >= 2 grid steps (v7x dual-TC + pipelining) but never below 1024
        # rows/step so the ~0.35 us step overhead stays amortized.
        half = _round_up((B_pad_full + 1) // 2, 128)
        tb = max(1024, min(tb_cap, half))

    num_tiles = -(-B_pad_full // tb)
    b_pad = num_tiles * tb
    return tb, num_tiles, b_pad


def qm_region_model_forward(x, params):
    """Fused 3-layer MLP forward.

    x: (B, input_dim) float32 (bf16 also accepted; it is used directly as the
       fc1 MXU operand, halving the x HBM stream).
    params: dict with w1 (D,128), b1 (1,128), w2 (128,64), b2 (1,64),
            w3 (64,1), b3 scalar-like (all float32).
    returns: (B, 1) float32
    """
    B, D = x.shape
    w1 = params["w1"].astype(jnp.bfloat16)     # (D, 128)  bf16 MXU operand
    b1 = params["b1"].reshape(1, 128)          # (1, 128)  f32
    w2 = params["w2"].astype(jnp.bfloat16)     # (128, 64) bf16 MXU operand
    b2 = params["b2"].reshape(1, 64)           # (1, 64)   f32
    w3 = params["w3"].reshape(1, 64)           # (1, 64)   f32 row for fc3
    b3 = params["b3"].reshape(1)               # (1,)      f32 scalar -> SMEM

    TB, num_tiles, B_pad = _choose_batch_tile(B, D)
    if B_pad != B:
        x = jnp.pad(x, ((0, B_pad - B), (0, 0)))

    # Weights/biases: constant block index -> DMA'd once, stay resident in VMEM.
    def resident(a):
        nd = a.ndim
        return pl.BlockSpec(a.shape, lambda i, _nd=nd: (0,) * _nd)

    x_bytes = x.size * x.dtype.itemsize
    flops = 2 * B_pad * (D * 128 + 128 * 64 + 64)
    bytes_accessed = (x_bytes + B_pad * 4
                      + w1.size * 2 + w2.size * 2
                      + (b1.size + b2.size + w3.size + b3.size) * 4)

    out = pl.pallas_call(
        qm_mlp_kernel,
        out_shape=jax.ShapeDtypeStruct((B_pad, 1), jnp.float32),
        grid=(num_tiles,),
        in_specs=[
            pl.BlockSpec((TB, D), lambda i: (i, 0)),            # x tile (pipelined)
            resident(w1), resident(b1),
            resident(w2), resident(b2),
            resident(w3),
            pl.BlockSpec(memory_space=pltpu.MemorySpace.SMEM),  # b3 scalar
        ],
        out_specs=pl.BlockSpec((TB, 1), lambda i: (i, 0)),
        compiler_params=pltpu.CompilerParams(
            dimension_semantics=("parallel",),                  # v7x dual-TC split
            vmem_limit_bytes=48 * 1024 * 1024),                 # > v5e/v6e defaults,
                                                                # < v7x 64 MiB/TC
        cost_estimate=pl.CostEstimate(flops=flops, transcendentals=0,
                                      bytes_accessed=bytes_accessed),
    )(x, w1, b1, w2, b2, w3, b3)

    return out[:B]


def init_params(key, input_dim):
    """Deterministic init mimicking PyTorch nn.Linear default
    (uniform in [-1/sqrt(fan_in), 1/sqrt(fan_in)])."""
    def linear(k, fan_in, fan_out):
        kw, kb = jax.random.split(k)
        bound = 1.0 / jnp.sqrt(fan_in)
        w = jax.random.uniform(kw, (fan_in, fan_out), jnp.float32, -bound, bound)
        b = jax.random.uniform(kb, (1, fan_out), jnp.float32, -bound, bound)
        return w, b

    k1, k2, k3 = jax.random.split(key, 3)
    w1, b1 = linear(k1, input_dim, 128)
    w2, b2 = linear(k2, 128, 64)
    w3, b3 = linear(k3, 64, 1)
    return {"w1": w1, "b1": b1, "w2": w2, "b2": b2, "w3": w3, "b3": b3}


def reference_forward(x, p):
    """Reference with the same mixed precision as the kernel:
    bf16 MXU operands for fc1/fc2, f32 accumulation + f32 bias/ReLU epilogue,
    f32 fc3."""
    w1 = p["w1"].astype(jnp.bfloat16)
    w2 = p["w2"].astype(jnp.bfloat16)
    h1 = jnp.dot(x.astype(jnp.bfloat16), w1,
                 preferred_element_type=jnp.float32) + p["b1"]
    h1 = jnp.maximum(h1, 0.0)
    h2 = jnp.dot(h1.astype(jnp.bfloat16), w2,
                 preferred_element_type=jnp.float32) + p["b2"]
    h2 = jnp.maximum(h2, 0.0)
    return jnp.dot(h2, p["w3"], preferred_element_type=jnp.float32) + p["b3"]


if __name__ == "__main__":
    key = jax.random.PRNGKey(0)
    k_params, k_x = jax.random.split(key)

    batch, input_dim = 8, 32
    params = init_params(k_params, input_dim)
    x = jax.random.normal(k_x, (batch, input_dim), jnp.float32)

    out = qm_region_model_forward(x, params)
    out = jax.block_until_ready(out)

    ref = reference_forward(x, params)
    assert out.shape == (batch, 1), out.shape
    assert jnp.allclose(out, ref, atol=1e-4, rtol=1e-4), "mismatch vs reference"

    print("KERNEL_OK")
</pallas_src>

<mosaic_0001>
module attributes {stable_mosaic.version = 11 : i64} {
  func.func @qm_mlp_kernel(%arg0: i32, %arg1: memref<128x32xf32, #tpu.memory_space<vmem>>, %arg2: memref<32x128xbf16, #tpu.memory_space<vmem>>, %arg3: memref<1x128xf32, #tpu.memory_space<vmem>>, %arg4: memref<128x64xbf16, #tpu.memory_space<vmem>>, %arg5: memref<1x64xf32, #tpu.memory_space<vmem>>, %arg6: memref<1x64xf32, #tpu.memory_space<vmem>>, %arg7: memref<1xf32, #tpu.memory_space<smem>>, %arg8: memref<128x1xf32, #tpu.memory_space<vmem>>) attributes {dimension_semantics = [#tpu.dimension_semantics<parallel>], iteration_bounds = array<i64: 1>, scalar_prefetch = 0 : i64, scratch_operands = 0 : i64, tpu.core_type = #tpu.core_type<tc>, window_params = [{transform_indices = @transform_0, window_bounds = array<i64: 128, 32>}, {pipeline_mode = #tpu.pipeline_mode<synchronous>, transform_indices = @transform_1, window_bounds = array<i64: 32, 128>}, {pipeline_mode = #tpu.pipeline_mode<synchronous>, transform_indices = @transform_2, window_bounds = array<i64: 1, 128>}, {pipeline_mode = #tpu.pipeline_mode<synchronous>, transform_indices = @transform_3, window_bounds = array<i64: 128, 64>}, {pipeline_mode = #tpu.pipeline_mode<synchronous>, transform_indices = @transform_4, window_bounds = array<i64: 1, 64>}, {pipeline_mode = #tpu.pipeline_mode<synchronous>, transform_indices = @transform_5, window_bounds = array<i64: 1, 64>}, {transform_indices = @transform_6, window_bounds = array<i64: 1>}, {transform_indices = @transform_7, window_bounds = array<i64: 128, 1>}]} {
    %c0 = arith.constant 0 : index
    %c0_0 = arith.constant 0 : index
    %0 = vector.load %arg1[%c0, %c0_0] : memref<128x32xf32, #tpu.memory_space<vmem>>, vector<128x32xf32>
    %1 = arith.truncf %0 : vector<128x32xf32> to vector<128x32xbf16>
    %c0_1 = arith.constant 0 : index
    %c0_2 = arith.constant 0 : index
    %2 = vector.load %arg2[%c0_1, %c0_2] : memref<32x128xbf16, #tpu.memory_space<vmem>>, vector<32x128xbf16>
    %cst = arith.constant dense<0.000000e+00> : vector<128x128xf32>
    %3 = tpu.matmul %1, %2, %cst {dimension_numbers = #tpu.dot_dimension_numbers<[1], [0], [0], [1], [0, 0, 1, 1], [], []>} : vector<128x32xbf16>, vector<32x128xbf16>, vector<128x128xf32> -> vector<128x128xf32>
    %c0_3 = arith.constant 0 : index
    %c0_4 = arith.constant 0 : index
    %4 = vector.load %arg3[%c0_3, %c0_4] : memref<1x128xf32, #tpu.memory_space<vmem>>, vector<1x128xf32>
    %5 = vector.broadcast %4 : vector<1x128xf32> to vector<128x128xf32>
    %6 = arith.addf %3, %5 : vector<128x128xf32>
    %cst_5 = arith.constant 0.000000e+00 : f32
    %7 = vector.broadcast %cst_5 : f32 to vector<128x128xf32>
    %8 = arith.maximumf %6, %7 : vector<128x128xf32>
    %9 = arith.truncf %8 : vector<128x128xf32> to vector<128x128xbf16>
    %c0_6 = arith.constant 0 : index
    %c0_7 = arith.constant 0 : index
    %10 = vector.load %arg4[%c0_6, %c0_7] : memref<128x64xbf16, #tpu.memory_space<vmem>>, vector<128x64xbf16>
    %cst_8 = arith.constant dense<0.000000e+00> : vector<128x64xf32>
    %11 = tpu.matmul %9, %10, %cst_8 {dimension_numbers = #tpu.dot_dimension_numbers<[1], [0], [0], [1], [0, 0, 1, 1], [], []>} : vector<128x128xbf16>, vector<128x64xbf16>, vector<128x64xf32> -> vector<128x64xf32>
    %c0_9 = arith.constant 0 : index
    %c0_10 = arith.constant 0 : index
    %12 = vector.load %arg5[%c0_9, %c0_10] : memref<1x64xf32, #tpu.memory_space<vmem>>, vector<1x64xf32>
    %13 = vector.broadcast %12 : vector<1x64xf32> to vector<128x64xf32>
    %14 = arith.addf %11, %13 : vector<128x64xf32>
    %cst_11 = arith.constant 0.000000e+00 : f32
    %15 = vector.broadcast %cst_11 : f32 to vector<128x64xf32>
    %16 = arith.maximumf %14, %15 : vector<128x64xf32>
    %c0_12 = arith.constant 0 : index
    %c0_13 = arith.constant 0 : index
    %17 = vector.load %arg6[%c0_12, %c0_13] : memref<1x64xf32, #tpu.memory_space<vmem>>, vector<1x64xf32>
    %18 = vector.broadcast %17 : vector<1x64xf32> to vector<128x64xf32>
    %19 = arith.mulf %16, %18 : vector<128x64xf32>
    %cst_14 = arith.constant dense<0.000000e+00> : vector<128xf32>
    %20 = vector.multi_reduction <add>, %19, %cst_14 [1] : vector<128x64xf32> to vector<128xf32>
    %21 = vector.shape_cast %20 : vector<128xf32> to vector<128x1xf32>
    %c0_15 = arith.constant 0 : index
    %22 = memref.load %arg7[%c0_15] : memref<1xf32, #tpu.memory_space<smem>>
    %23 = vector.broadcast %22 : f32 to vector<128x1xf32>
    %24 = arith.addf %21, %23 : vector<128x1xf32>
    %c0_16 = arith.constant 0 : index
    %c0_17 = arith.constant 0 : index
    %25 = vector.load %arg8[%c0_16, %c0_17] : memref<128x1xf32, #tpu.memory_space<vmem>>, vector<128x1xf32>
    tpu.vector_store %arg8[%c0_16, %c0_17], %24 {strides = array<i32>} : memref<128x1xf32, #tpu.memory_space<vmem>>, vector<128x1xf32>,
    return
  }
  func.func @transform_0(%arg0: i32) -> (i32, i32) {
    %c0_i32 = arith.constant 0 : i32
    %c0_i32_0 = arith.constant 0 : i32
    return %arg0, %c0_i32 : i32, i32
  }
  func.func @transform_1(%arg0: i32) -> (i32, i32) {
    %c0_i32 = arith.constant 0 : i32
    %c0_i32_0 = arith.constant 0 : i32
    %c0_i32_1 = arith.constant 0 : i32
    return %c0_i32, %c0_i32_0 : i32, i32
  }
  func.func @transform_2(%arg0: i32) -> (i32, i32) {
    %c0_i32 = arith.constant 0 : i32
    %c0_i32_0 = arith.constant 0 : i32
    %c0_i32_1 = arith.constant 0 : i32
    return %c0_i32, %c0_i32_0 : i32, i32
  }
  func.func @transform_3(%arg0: i32) -> (i32, i32) {
    %c0_i32 = arith.constant 0 : i32
    %c0_i32_0 = arith.constant 0 : i32
    %c0_i32_1 = arith.constant 0 : i32
    return %c0_i32, %c0_i32_0 : i32, i32
  }
  func.func @transform_4(%arg0: i32) -> (i32, i32) {
    %c0_i32 = arith.constant 0 : i32
    %c0_i32_0 = arith.constant 0 : i32
    %c0_i32_1 = arith.constant 0 : i32
    return %c0_i32, %c0_i32_0 : i32, i32
  }
  func.func @transform_5(%arg0: i32) -> (i32, i32) {
    %c0_i32 = arith.constant 0 : i32
    %c0_i32_0 = arith.constant 0 : i32
    %c0_i32_1 = arith.constant 0 : i32
    return %c0_i32, %c0_i32_0 : i32, i32
  }
  func.func @transform_6(%arg0: i32) -> i32 {
    %c0_i32 = arith.constant 0 : i32
    %c0_i32_0 = arith.constant 0 : i32
    return %c0_i32 : i32
  }
  func.func @transform_7(%arg0: i32) -> (i32, i32) {
    %c0_i32 = arith.constant 0 : i32
    %c0_i32_0 = arith.constant 0 : i32
    return %arg0, %c0_i32 : i32, i32
  }
}

</mosaic_0001>

<bundles_post_ra>
// kernel: tpu_custom_call.1
= control target key start
LH: loop header
LB: loop body
LE: loop exit
PB: predicated region body
PF: predicated region fallthrough
CT: control target
= control target key end

     0   :  { %vm72_vm0 = vcmask 261120   ;;  %vm323_vm1 = vcmask 523264   ;;  %vm390_vm2 = vcmask 7168   ;;  %s736_s1 = inlined_call_operand.vmem [shape: bf16[32,128], index: 1, kind: input, shape index: {}]   ;;  %s737_s0 = inlined_call_operand.vmem [shape: f32[128,32], index: 0, kind: input, shape index: {}]   ;;  %s738_s2 = inlined_call_operand.vmem [shape: f32[1,128], index: 2, kind: input, shape index: {}]   ;;  %s739_s3 = inlined_call_operand.vmem [shape: bf16[128,64], index: 3, kind: input, shape index: {}]   ;;  %s740_s4 = inlined_call_operand.vmem [shape: f32[1,64], index: 4, kind: input, shape index: {}]   ;;  %s741_s5 = inlined_call_operand.vmem [shape: f32[1,64], index: 5, kind: input, shape index: {}]   ;;  %s742_s6 = inlined_call_operand.<no memory space> [shape: f32[1], index: 6, kind: input, shape index: {}]   ;;  %s743_s7 = inlined_call_operand.vmem [shape: f32[128,1], index: 7, kind: output, shape index: {}]  }
   0x1   :  { %v460_v0 = vld [vmem:[%s736_s1 + $0x8] sm:$0xff]  ;;  %v459_v1 = vld [vmem:[%s736_s1] sm:$0xff]  ;;  %v30_v5 = vld [vmem:[%s737_s0 + $0x10] sm:$0xff] }
   0x2   :  { %103 = vmatpush.bf16.msra.mxu0 %v460_v0  ;;  %v28_v2 = vld [vmem:[%s737_s0] sm:$0xff]  ;;  %v29_v3 = vld [vmem:[%s737_s0 + $0x8] sm:$0xff]  ;;  %469 = vmatpush.bf16.msra.mxu3 %v460_v0  ;;  %v31_v6 = vld [vmem:[%s737_s0 + $0x18] sm:$0xff] }
   0x3   :  { %v44_v4 = vpack.c.bf16 %v29_v3, %v28_v2  ;;  %v45_v7 = vpack.c.bf16 %v31_v6, %v30_v5  ;;  %v32_v8 = vld [vmem:[%s737_s0 + $0x20] sm:$0xff]  ;;  %v33_v9 = vld [vmem:[%s737_s0 + $0x28] sm:$0xff]  ;;  %v38_v11 = vld [vmem:[%s737_s0 + $0x50] sm:$0xff] }
   0x4   :  { %v46_v10 = vpack.c.bf16 %v33_v9, %v32_v8  ;;  %v39_v12 = vld [vmem:[%s737_s0 + $0x58] sm:$0xff]  ;;  %v467_v15 = vld [vmem:[%s739_s3 + $0x30] sm:$0xff]  ;;  %v466_v16 = vld [vmem:[%s739_s3 + $0x28] sm:$0xff] }
   0x5   :  { %v49_v13 = vpack.c.bf16 %v39_v12, %v38_v11  ;;  %v468_v14 = vld [vmem:[%s739_s3 + $0x38] sm:$0xff]  ;;  %v34_v17 = vld [vmem:[%s737_s0 + $0x30] sm:$0xff]  ;;  %v40_v19 = vld [vmem:[%s737_s0 + $0x60] sm:$0xff] }
   0x6   :  { %104 = vmatpush.bf16.msra.mxu0 %v459_v1  ;;  %470 = vmatpush.bf16.msra.mxu3 %v459_v1  ;;  %v35_v18 = vld [vmem:[%s737_s0 + $0x38] sm:$0xff]  ;;  %v41_v20 = vld [vmem:[%s737_s0 + $0x68] sm:$0xff]  ;;  %v465_v22 = vld [vmem:[%s739_s3 + $0x20] sm:$0xff] }
   0x7   :  { %238 = vmatpush.bf16.msra.mxu1 %v468_v14  ;;  %471 = vmatpush.bf16.msra.mxu2 %v468_v14  ;;  %v47_v21 = vpack.c.bf16 %v35_v18, %v34_v17  ;;  %v50_v23 = vpack.c.bf16 %v41_v20, %v40_v19  ;;  %v36_v24 = vld [vmem:[%s737_s0 + $0x40] sm:$0xff]  ;;  %v37_v25 = vld [vmem:[%s737_s0 + $0x48] sm:$0xff]  ;;  %v42_v26 = vld [vmem:[%s737_s0 + $0x70] sm:$0xff] }
   0x8   :  { %v43_v27 = vld [vmem:[%s737_s0 + $0x78] sm:$0xff]  ;;  %v48_v28 = vpack.c.bf16 %v37_v25, %v36_v24  ;;  %v463_v31 = vld [vmem:[%s739_s3 + $0x10] sm:$0xff]  ;;  %v462_v32 = vld [vmem:[%s739_s3 + $0x8] sm:$0xff] }
   0x9   :  { %419 = vmatmul.msk.bf16.vlgmr.msra.gmra.mxu0 %vm72_vm0, %v44_v4  ;;  %424 = vmatmul.msk.bf16.vlgmr.msra.gmra.mxu3 %vm72_vm0, %v49_v13  ;;  %v51_v29 = vpack.c.bf16 %v43_v27, %v42_v26  ;;  %v464_v30 = vld [vmem:[%s739_s3 + $0x18] sm:$0xff]  ;;  %v461_v33 = vld [vmem:[%s739_s3] sm:$0xff] }
   0xa   :  { %v479_v35 = vld [vmem:[%s738_s2] ss:$0 sm:$0xff] }
   0xb   :  { %239 = vmatpush.bf16.msra.mxu1 %v467_v15  ;;  %472 = vmatpush.bf16.msra.mxu2 %v467_v15  ;;  %v614_v27 = vld [vmem:[%s740_s4] ss:$0 sm:$0xff] }
   0xf   :  { %240 = vmatpush.bf16.msra.mxu1 %v466_v16  ;;  %473 = vmatpush.bf16.msra.mxu2 %v466_v16 }
  0x13   :  { %241 = vmatpush.bf16.msra.mxu1 %v465_v22  ;;  %474 = vmatpush.bf16.msra.mxu2 %v465_v22 }
  0x17   :  { %242 = vmatpush.bf16.msra.mxu1 %v464_v30  ;;  %475 = vmatpush.bf16.msra.mxu2 %v464_v30  ;;  %v620_v30 = vld [vmem:[%s741_s5] ss:$0 sm:$0xff] }
  0x19   :  { %420 = vmatmul.msk.bf16.gmra.mxu0 %vm72_vm0, %v45_v7  ;;  %425 = vmatmul.msk.bf16.gmra.mxu3 %vm72_vm0, %v50_v23 }
  0x1b   :  { %243 = vmatpush.bf16.msra.mxu1 %v463_v31  ;;  %476 = vmatpush.bf16.msra.mxu2 %v463_v31 }
  0x1f   :  { %244 = vmatpush.bf16.msra.mxu1 %v462_v32  ;;  %477 = vmatpush.bf16.msra.mxu2 %v462_v32 }
  0x23   :  { %245 = vmatpush.bf16.msra.mxu1 %v461_v33  ;;  %478 = vmatpush.bf16.msra.mxu2 %v461_v33 }
  0x29   :  { %421 = vmatmul.msk.bf16.gmra.mxu0 %vm72_vm0, %v46_v10  ;;  %426 = vmatmul.msk.bf16.gmra.mxu3 %vm72_vm0, %v51_v29 }
  0x39   :  { %422 = vmatmul.msk.bf16.gmra.mxu0 %vm72_vm0, %v47_v21 }
  0x49   :  { %423 = vmatmul.msk.bf16.gmra.mxu0 %vm72_vm0, %v48_v28 }
  0x86   :  { %v106_v34 = vpop.f32.mrf.mxu0 }
  0x87   :  { %v107_v36 = vadd.f32 %v479_v35, %v106_v34 }
  0x89   :  { %v146_v39 = vmax.f32 %v107_v36, 0.0 }
  0x8c   :  { %v131_v0 = vpop.f32.mrf.mxu3 }
  0x8d   :  { %v132_v9 = vadd.f32 %v479_v35, %v131_v0 }
  0x8e   :  { %v108_v37 = vpop.f32.mrf.mxu0 }
  0x8f   :  { %v109_v38 = vadd.f32 %v479_v35, %v108_v37  ;;  %v156_v11 = vmax.f32 %v132_v9, 0.0 }
  0x91   :  { %v147_v40 = vmax.f32 %v109_v38, 0.0 }
  0x93   :  { %v162_v41 = vpack.c.bf16 %v147_v40, %v146_v39 }
  0x94   :  { %v133_v4 = vpop.f32.mrf.mxu3 }
  0x95   :  { %246 = vmatmul.bf16.vlgmr.msra.gmra.mxu1 %v162_v41  ;;  %v134_v10 = vadd.f32 %v479_v35, %v133_v4 }
  0x96   :  { %v111_v42 = vpop.f32.mrf.mxu0 }
  0x97   :  { %v112_v43 = vadd.f32 %v479_v35, %v111_v42  ;;  %v157_v12 = vmax.f32 %v134_v10, 0.0 }
  0x99   :  { %v148_v46 = vmax.f32 %v112_v43, 0.0  ;;  %v167_v13 = vpack.c.bf16 %v157_v12, %v156_v11 }
  0x9c   :  { %v136_v8 = vpop.f32.mrf.mxu3 }
  0x9d   :  { %v137_v15 = vadd.f32 %v479_v35, %v136_v8 }
  0x9e   :  { %v113_v44 = vpop.f32.mrf.mxu0 }
  0x9f   :  { %v114_v45 = vadd.f32 %v479_v35, %v113_v44  ;;  %v158_v18 = vmax.f32 %v137_v15, 0.0 }
  0xa1   :  { %v149_v47 = vmax.f32 %v114_v45, 0.0 }
  0xa3   :  { %v163_v48 = vpack.c.bf16 %v149_v47, %v148_v46 }
  0xa4   :  { %v138_v14 = vpop.f32.mrf.mxu3 }
  0xa5   :  { %251 = vmatmul.bf16.gmra.mxu1 %v163_v48  ;;  %v139_v16 = vadd.f32 %v479_v35, %v138_v14 }
  0xa6   :  { %v116_v49 = vpop.f32.mrf.mxu0 }
  0xa7   :  { %v117_v50 = vadd.f32 %v479_v35, %v116_v49  ;;  %v159_v19 = vmax.f32 %v139_v16, 0.0 }
  0xa9   :  { %v150_v53 = vmax.f32 %v117_v50, 0.0  ;;  %v168_v20 = vpack.c.bf16 %v159_v19, %v158_v18 }
  0xac   :  { %v141_v17 = vpop.f32.mrf.mxu3 }
  0xad   :  { %v142_v22 = vadd.f32 %v479_v35, %v141_v17 }
  0xae   :  { %v118_v51 = vpop.f32.mrf.mxu0 }
  0xaf   :  { %v119_v52 = vadd.f32 %v479_v35, %v118_v51  ;;  %v160_v24 = vmax.f32 %v142_v22, 0.0 }
  0xb1   :  { %v151_v54 = vmax.f32 %v119_v52, 0.0 }
  0xb3   :  { %v164_v55 = vpack.c.bf16 %v151_v54, %v150_v53 }
  0xb4   :  { %v143_v21 = vpop.f32.mrf.mxu3 }
  0xb5   :  { %256 = vmatmul.bf16.gmra.mxu1 %v164_v55  ;;  %v144_v23 = vadd.f32 %v479_v35, %v143_v21 }
  0xb6   :  { %v121_v56 = vpop.f32.mrf.mxu0 }
  0xb7   :  { %v122_v57 = vadd.f32 %v479_v35, %v121_v56  ;;  %v161_v25 = vmax.f32 %v144_v23, 0.0 }
  0xb9   :  { %v152_v60 = vmax.f32 %v122_v57, 0.0  ;;  %v169_v26 = vpack.c.bf16 %v161_v25, %v160_v24 }
  0xbe   :  { %v123_v58 = vpop.f32.mrf.mxu0 }
  0xbf   :  { %v124_v59 = vadd.f32 %v479_v35, %v123_v58 }
  0xc1   :  { %v153_v61 = vmax.f32 %v124_v59, 0.0 }
  0xc3   :  { %v165_v62 = vpack.c.bf16 %v153_v61, %v152_v60 }
  0xc5   :  { %261 = vmatmul.bf16.gmra.mxu1 %v165_v62 }
  0xc6   :  { %v126_v63 = vpop.f32.mrf.mxu0 }
  0xc7   :  { %v127_v1 = vadd.f32 %v479_v35, %v126_v63 }
  0xc9   :  { %v154_v5 = vmax.f32 %v127_v1, 0.0 }
  0xce   :  { %v128_v2 = vpop.f32.mrf.mxu0 }
  0xcf   :  { %v129_v3 = vadd.f32 %v479_v35, %v128_v2 }
  0xd1   :  { %v155_v6 = vmax.f32 %v129_v3, 0.0 }
  0xd3   :  { %v166_v7 = vpack.c.bf16 %v155_v6, %v154_v5 }
  0xd5   :  { %266 = vmatmul.bf16.vlgmr.msra.gmra.mxu2 %v166_v7 }
  0xe5   :  { %271 = vmatmul.bf16.gmra.mxu2 %v167_v13 }
  0xf5   :  { %276 = vmatmul.bf16.gmra.mxu2 %v168_v20 }
 0x105   :  { %281 = vmatmul.bf16.gmra.mxu2 %v169_v26 }
 0x112   :  { %v247_v28 = vpop.f32.mrf.mxu1 }
 0x113   :  { %v248_v29 = vadd.f32 %v614_v27, %v247_v28 }
 0x115   :  { %v287_v31 = vmax.f32 %v248_v29, 0.0 }
 0x117   :  { %v307_v32 = vmul.f32 %v620_v30, %v287_v31 }
 0x119   :  { %v324_v33 = vsel %vm323_vm1, %v307_v32, 0.0 }
 0x11a   :  { %v249_v34 = vpop.f32.mrf.mxu1  ;;  %325 = vadd.xlane.f32.xlu0 %v324_v33 }
 0x11b   :  { %v250_v35 = vadd.f32 %v614_v27, %v249_v34 }
 0x11d   :  { %v288_v36 = vmax.f32 %v250_v35, 0.0 }
 0x11f   :  { %v308_v37 = vmul.f32 %v620_v30, %v288_v36 }
 0x121   :  { %v327_v38 = vsel %vm323_vm1, %v308_v37, 0.0 }
 0x122   :  { %v252_v39 = vpop.f32.mrf.mxu1  ;;  %328 = vadd.xlane.f32.xlu0 %v327_v38 }
 0x123   :  { %v253_v40 = vadd.f32 %v614_v27, %v252_v39 }
 0x125   :  { %v289_v41 = vmax.f32 %v253_v40, 0.0  ;;  %v373_v40 = vstv %s742_s6 }
 0x127   :  { %v309_v42 = vmul.f32 %v620_v30, %v289_v41 }
 0x129   :  { %v330_v43 = vsel %vm323_vm1, %v309_v42, 0.0 }
 0x12a   :  { %v254_v44 = vpop.f32.mrf.mxu1  ;;  %331 = vadd.xlane.f32.xlu1 %v330_v43 }
 0x12b   :  { %v255_v45 = vadd.f32 %v614_v27, %v254_v44 }
 0x12d   :  { %v290_v46 = vmax.f32 %v255_v45, 0.0 }
 0x12f   :  { %v310_v47 = vmul.f32 %v620_v30, %v290_v46 }
 0x131   :  { %v333_v48 = vsel %vm323_vm1, %v310_v47, 0.0 }
 0x132   :  { %v257_v49 = vpop.f32.mrf.mxu1  ;;  %334 = vadd.xlane.f32.xlu1 %v333_v48 }
 0x133   :  { %v258_v50 = vadd.f32 %v614_v27, %v257_v49 }
 0x135   :  { %v291_v51 = vmax.f32 %v258_v50, 0.0 }
 0x137   :  { %v311_v52 = vmul.f32 %v620_v30, %v291_v51 }
 0x139   :  { %v336_v53 = vsel %vm323_vm1, %v311_v52, 0.0 }
 0x13a   :  { %v259_v54 = vpop.f32.mrf.mxu1  ;;  %337 = vadd.xlane.f32.xlu2 %v336_v53 }
 0x13b   :  { %v260_v55 = vadd.f32 %v614_v27, %v259_v54 }
 0x13d   :  { %v292_v56 = vmax.f32 %v260_v55, 0.0 }
 0x13f   :  { %v312_v57 = vmul.f32 %v620_v30, %v292_v56 }
 0x141   :  { %v339_v58 = vsel %vm323_vm1, %v312_v57, 0.0 }
 0x142   :  { %v262_v59 = vpop.f32.mrf.mxu1  ;;  %340 = vadd.xlane.f32.xlu2 %v339_v58 }
 0x143   :  { %v263_v60 = vadd.f32 %v614_v27, %v262_v59 }
 0x145   :  { %v293_v61 = vmax.f32 %v263_v60, 0.0 }
 0x147   :  { %v313_v62 = vmul.f32 %v620_v30, %v293_v61 }
 0x149   :  { %v342_v63 = vsel %vm323_vm1, %v313_v62, 0.0 }
 0x14a   :  { %v264_v0 = vpop.f32.mrf.mxu1  ;;  %343 = vadd.xlane.f32.xlu0 %v342_v63 }
 0x14b   :  { %v265_v1 = vadd.f32 %v614_v27, %v264_v0 }
 0x14d   :  { %v294_v2 = vmax.f32 %v265_v1, 0.0 }
 0x14f   :  { %v314_v3 = vmul.f32 %v620_v30, %v294_v2 }
 0x151   :  { %v345_v4 = vsel %vm323_vm1, %v314_v3, 0.0 }
 0x152   :  { %346 = vadd.xlane.f32.xlu1 %v345_v4 }
 0x158   :  { %v267_v5 = vpop.f32.mrf.mxu2 }
 0x159   :  { %v268_v6 = vadd.f32 %v614_v27, %v267_v5 }
 0x15b   :  { %v295_v7 = vmax.f32 %v268_v6, 0.0 }
 0x15d   :  { %v315_v8 = vmul.f32 %v620_v30, %v295_v7 }
 0x15f   :  { %v348_v9 = vsel %vm323_vm1, %v315_v8, 0.0 }
 0x160   :  { %v269_v10 = vpop.f32.mrf.mxu2  ;;  %349 = vadd.xlane.f32.xlu2 %v348_v9 }
 0x161   :  { %v270_v11 = vadd.f32 %v614_v27, %v269_v10 }
 0x163   :  { %v296_v12 = vmax.f32 %v270_v11, 0.0 }
 0x165   :  { %v316_v13 = vmul.f32 %v620_v30, %v296_v12 }
 0x167   :  { %v351_v14 = vsel %vm323_vm1, %v316_v13, 0.0 }
 0x168   :  { %v272_v15 = vpop.f32.mrf.mxu2  ;;  %352 = vadd.xlane.f32.xlu0 %v351_v14 }
 0x169   :  { %v273_v16 = vadd.f32 %v614_v27, %v272_v15 }
 0x16b   :  { %v297_v17 = vmax.f32 %v273_v16, 0.0 }
 0x16d   :  { %v317_v18 = vmul.f32 %v620_v30, %v297_v17 }
 0x16f   :  { %v354_v19 = vsel %vm323_vm1, %v317_v18, 0.0 }
 0x170   :  { %v274_v20 = vpop.f32.mrf.mxu2  ;;  %355 = vadd.xlane.f32.xlu1 %v354_v19 }
 0x171   :  { %v275_v21 = vadd.f32 %v614_v27, %v274_v20 }
 0x173   :  { %v298_v22 = vmax.f32 %v275_v21, 0.0 }
 0x175   :  { %v318_v23 = vmul.f32 %v620_v30, %v298_v22 }
 0x177   :  { %v357_v24 = vsel %vm323_vm1, %v318_v23, 0.0 }
 0x178   :  { %v277_v25 = vpop.f32.mrf.mxu2  ;;  %358 = vadd.xlane.f32.xlu2 %v357_v24 }
 0x179   :  { %v278_v26 = vadd.f32 %v614_v27, %v277_v25 }
 0x17b   :  { %v299_v28 = vmax.f32 %v278_v26, 0.0 }
 0x17d   :  { %v319_v29 = vmul.f32 %v620_v30, %v299_v28 }
 0x17f   :  { %v360_v31 = vsel %vm323_vm1, %v319_v29, 0.0 }
 0x180   :  { %v279_v32 = vpop.f32.mrf.mxu2  ;;  %361 = vadd.xlane.f32.xlu0 %v360_v31 }
 0x181   :  { %v280_v33 = vadd.f32 %v614_v27, %v279_v32 }
 0x183   :  { %v300_v34 = vmax.f32 %v280_v33, 0.0 }
 0x185   :  { %v320_v35 = vmul.f32 %v620_v30, %v300_v34 }
 0x187   :  { %v363_v36 = vsel %vm323_vm1, %v320_v35, 0.0 }
 0x188   :  { %v282_v37 = vpop.f32.mrf.mxu2  ;;  %364 = vadd.xlane.f32.xlu1 %v363_v36 }
 0x189   :  { %v283_v38 = vadd.f32 %v614_v27, %v282_v37 }
 0x18b   :  { %v301_v39 = vmax.f32 %v283_v38, 0.0 }
 0x18d   :  { %v326_v41 = vpop.xlane.xlu0 %325  ;;  %v321_v42 = vmul.f32 %v620_v30, %v301_v39 }
 0x18e   :  { %v374_v43 = vadd.f32 %v373_v40, %v326_v41 }
 0x18f   :  { %v366_v44 = vsel %vm323_vm1, %v321_v42, 0.0 }
 0x190   :  { %391 = vst.msk [vmem:[%s743_s7] sm:$0xff] %vm390_vm2, %v374_v43  ;;  %v284_v45 = vpop.f32.mrf.mxu2  ;;  %367 = vadd.xlane.f32.xlu2 %v366_v44 }
 0x191   :  { %v285_v46 = vadd.f32 %v614_v27, %v284_v45 }
 0x193   :  { %v302_v47 = vmax.f32 %v285_v46, 0.0 }
 0x195   :  { %v329_v48 = vpop.xlane.xlu0 %328  ;;  %v322_v49 = vmul.f32 %v620_v30, %v302_v47 }
 0x196   :  { %v375_v50 = vadd.f32 %v373_v40, %v329_v48 }
 0x197   :  { %v369_v51 = vsel %vm323_vm1, %v322_v49, 0.0 }
 0x198   :  { %392 = vst.msk [vmem:[%s743_s7 + $0x8] sm:$0xff] %vm390_vm2, %v375_v50  ;;  %370 = vadd.xlane.f32.xlu0 %v369_v51 }
 0x19d   :  { %v332_v52 = vpop.xlane.xlu1 %331 }
 0x19e   :  { %v376_v53 = vadd.f32 %v373_v40, %v332_v52 }
 0x1a0   :  { %393 = vst.msk [vmem:[%s743_s7 + $0x10] sm:$0xff] %vm390_vm2, %v376_v53 }
 0x1a5   :  { %v335_v27 = vpop.xlane.xlu1 %334 }
 0x1a6   :  { %v377_v54 = vadd.f32 %v373_v40, %v335_v27 }
 0x1a8   :  { %394 = vst.msk [vmem:[%s743_s7 + $0x18] sm:$0xff] %vm390_vm2, %v377_v54 }
 0x1ad   :  { %v338_v30 = vpop.xlane.xlu2 %337 }
 0x1ae   :  { %v378_v55 = vadd.f32 %v373_v40, %v338_v30 }
 0x1b0   :  { %395 = vst.msk [vmem:[%s743_s7 + $0x20] sm:$0xff] %vm390_vm2, %v378_v55 }
 0x1b5   :  { %v341_v56 = vpop.xlane.xlu2 %340 }
 0x1b6   :  { %v379_v57 = vadd.f32 %v373_v40, %v341_v56 }
 0x1b8   :  { %396 = vst.msk [vmem:[%s743_s7 + $0x28] sm:$0xff] %vm390_vm2, %v379_v57 }
 0x1bd   :  { %v344_v58 = vpop.xlane.xlu0 %343 }
 0x1be   :  { %v380_v59 = vadd.f32 %v373_v40, %v344_v58 }
 0x1c0   :  { %397 = vst.msk [vmem:[%s743_s7 + $0x30] sm:$0xff] %vm390_vm2, %v380_v59 }
 0x1c5   :  { %v347_v60 = vpop.xlane.xlu1 %346 }
 0x1c6   :  { %v381_v61 = vadd.f32 %v373_v40, %v347_v60 }
 0x1c8   :  { %398 = vst.msk [vmem:[%s743_s7 + $0x38] sm:$0xff] %vm390_vm2, %v381_v61 }
 0x1d3   :  { %v350_v62 = vpop.xlane.xlu2 %349 }
 0x1d4   :  { %v382_v63 = vadd.f32 %v373_v40, %v350_v62 }
 0x1d6   :  { %399 = vst.msk [vmem:[%s743_s7 + $0x40] sm:$0xff] %vm390_vm2, %v382_v63 }
 0x1db   :  { %v353_v0 = vpop.xlane.xlu0 %352 }
 0x1dc   :  { %v383_v1 = vadd.f32 %v373_v40, %v353_v0 }
 0x1de   :  { %400 = vst.msk [vmem:[%s743_s7 + $0x48] sm:$0xff] %vm390_vm2, %v383_v1 }
 0x1e3   :  { %v356_v2 = vpop.xlane.xlu1 %355 }
 0x1e4   :  { %v384_v3 = vadd.f32 %v373_v40, %v356_v2 }
 0x1e6   :  { %401 = vst.msk [vmem:[%s743_s7 + $0x50] sm:$0xff] %vm390_vm2, %v384_v3 }
 0x1eb   :  { %v359_v4 = vpop.xlane.xlu2 %358 }
 0x1ec   :  { %v385_v5 = vadd.f32 %v373_v40, %v359_v4 }
 0x1ee   :  { %402 = vst.msk [vmem:[%s743_s7 + $0x58] sm:$0xff] %vm390_vm2, %v385_v5 }
 0x1f3   :  { %v362_v6 = vpop.xlane.xlu0 %361 }
 0x1f4   :  { %v386_v7 = vadd.f32 %v373_v40, %v362_v6 }
 0x1f6   :  { %403 = vst.msk [vmem:[%s743_s7 + $0x60] sm:$0xff] %vm390_vm2, %v386_v7 }
 0x1fb   :  { %v365_v8 = vpop.xlane.xlu1 %364 }
 0x1fc   :  { %v387_v9 = vadd.f32 %v373_v40, %v365_v8 }
 0x1fe   :  { %404 = vst.msk [vmem:[%s743_s7 + $0x68] sm:$0xff] %vm390_vm2, %v387_v9 }
 0x203   :  { %v368_v10 = vpop.xlane.xlu2 %367 }
 0x204   :  { %v388_v11 = vadd.f32 %v373_v40, %v368_v10 }
 0x206   :  { %405 = vst.msk [vmem:[%s743_s7 + $0x70] sm:$0xff] %vm390_vm2, %v388_v11 }
 0x20b   :  { %v371_v12 = vpop.xlane.xlu0 %370 }
 0x20c   :  { %v389_v13 = vadd.f32 %v373_v40, %v371_v12 }
 0x20e   :  { %406 = vst.msk [vmem:[%s743_s7 + $0x78] sm:$0xff] %vm390_vm2, %v389_v13 }

</bundles_post_ra>
